<compile_context>
chip_gen: v6e
topology: v6e:2x2x1
jax: 0.10.0
libtpu: 0.0.40
codegen_flags: <defaults>
</compile_context>

<pallas_src>
import functools

import jax
import jax.numpy as jnp
from jax.experimental import pallas as pl
from jax.experimental.pallas import tpu as pltpu


# ----------------------------- Pallas kernels -----------------------------

def _enc_bias_kernel(x_ref, w_ref, b_ref, o_ref):
    # x:(1,E,T)  w:(H,E)  b:(H,1)  ->  o:(1,H,T) = Softsign(W @ x + b)
    y = jnp.dot(w_ref[...].astype(jnp.bfloat16), x_ref[0].astype(jnp.bfloat16),
                preferred_element_type=jnp.float32) + b_ref[...]
    o_ref[0] = y / (1.0 + jnp.abs(y))            # Softsign


def enc_bias_call(x_t, w_t, b_col):
    # x_t:(N,E,T)  w_t:(H,E)  b_col:(H,1)  -> (N,H,T)
    # TODO(synk): for very long utterances add a T-tile grid axis (512-lane blocks).
    N, E, T = x_t.shape
    H = w_t.shape[0]
    return pl.pallas_call(
        _enc_bias_kernel,
        grid=(N,),
        in_specs=[pl.BlockSpec((1, E, T), lambda n: (n, 0, 0)),
                  pl.BlockSpec((H, E), lambda n: (0, 0)),
                  pl.BlockSpec((H, 1), lambda n: (0, 0))],
        out_specs=pl.BlockSpec((1, H, T), lambda n: (n, 0, 0)),
        out_shape=jax.ShapeDtypeStruct((N, H, T), jnp.float32),
        compiler_params=pltpu.CompilerParams(dimension_semantics=("parallel",)),
    )(x_t, w_t, b_col)


def _vec_bias_kernel(dec_ref, spkr_ref, speed_ref, w1_ref, b1_ref, w2_ref, b2_ref,
                     wdec_ref, wspkr_ref, wspeed_ref, o_ref):
    # prenet: Linear -> ReLU -> Linear -> ReLU  (Dropout = identity, eval mode)
    # TODO(synk): training-mode Dropout in the prenet is not modeled.
    h1 = jnp.maximum(jnp.dot(dec_ref[...], w1_ref[...],
                             preferred_element_type=jnp.float32) + b1_ref[...], 0.0)
    pre = jnp.maximum(jnp.dot(h1, w2_ref[...],
                              preferred_element_type=jnp.float32) + b2_ref[...], 0.0)
    d = jnp.dot(pre, wdec_ref[...], preferred_element_type=jnp.float32)       # in_att_linear_dec
    s = jnp.dot(spkr_ref[...], wspkr_ref[...], preferred_element_type=jnp.float32)
    s = s / (1.0 + jnp.abs(s))                                                # Softsign (spkr branch)
    sp = speed_ref[...] * wspeed_ref[...]                                     # Linear(1->H), no bias
    o_ref[...] = d + s + sp


def vec_bias_call(dec_spkr, spkr, speed_col, params):
    # Per-decoder-step state: only N rows -> single block, nothing to tile.
    N = dec_spkr.shape[0]
    H = params['dec_w'].shape[1]
    D2 = params['pre_w1'].shape[1]
    D = params['pre_w2'].shape[1]
    return pl.pallas_call(
        _vec_bias_kernel,
        out_shape=jax.ShapeDtypeStruct((N, H), jnp.float32),
    )(dec_spkr, spkr, speed_col,
      params['pre_w1'], params['pre_b1'].reshape(1, D2),
      params['pre_w2'], params['pre_b2'].reshape(1, D),
      params['dec_w'], params['spkr_w'], params['speed_w'])


def _attention_kernel(enc_ref, pat_ref, vec_ref, mask_ref, wconv_ref, watt_ref, batt_ref,
                      o_ref):
    # Conv1d(1->H, k=31, pad=15, no bias) fused as a (H,31)@(31,T) matmul over prev-att taps.
    conv = jnp.dot(wconv_ref[...].astype(jnp.bfloat16), pat_ref[0].astype(jnp.bfloat16),
                   preferred_element_type=jnp.float32)                        # (H, T)
    e = enc_ref[0] + conv + vec_ref[0]                                        # (H,T)+(H,T)+(H,1)
    te = jnp.tanh(e)
    logit = jnp.dot(watt_ref[...], te,
                    preferred_element_type=jnp.float32) + batt_ref[...]       # (1, T)
    m = jnp.max(logit, axis=1, keepdims=True)                                 # unmasked max (torch)
    att = jnp.exp(logit - m) * mask_ref[0]
    denom = jnp.maximum(jnp.sum(jnp.abs(att), axis=1, keepdims=True), 1e-12)  # F.normalize eps
    o_ref[0] = att / denom


def attention_call(bias_enc, patches, vec_bias, mask, wconv, watt, batt):
    N, H, T = bias_enc.shape
    K = patches.shape[1]
    return pl.pallas_call(
        _attention_kernel,
        grid=(N,),
        in_specs=[pl.BlockSpec((1, H, T), lambda n: (n, 0, 0)),   # att_bias_enc
                  pl.BlockSpec((1, K, T), lambda n: (n, 0, 0)),   # conv taps
                  pl.BlockSpec((1, H, 1), lambda n: (n, 0, 0)),   # per-step vector bias
                  pl.BlockSpec((1, 1, T), lambda n: (n, 0, 0)),   # window mask
                  pl.BlockSpec((H, K), lambda n: (0, 0)),         # conv weight
                  pl.BlockSpec((1, H), lambda n: (0, 0)),         # att_proj weight
                  pl.BlockSpec((1, 1), lambda n: (0, 0))],        # att_proj bias
        out_specs=pl.BlockSpec((1, 1, T), lambda n: (n, 0, 0)),
        out_shape=jax.ShapeDtypeStruct((N, 1, T), jnp.float32),
        compiler_params=pltpu.CompilerParams(dimension_semantics=("parallel",)),
    )(bias_enc, patches, vec_bias, mask, wconv, watt, batt)


# ----------------------------- JAX glue ------------------------------------

def window_mask(prev, lengths, att_range, T):
    # torch (no_grad): scatter 1 at min(clamp(argmax ± i, min=0), len-1) for i in range(att_range)
    # == indicator of the contiguous index range [lo, hi].
    amax = jnp.argmax(prev, axis=1).astype(jnp.int32)   # first-max, like torch
    last = lengths.astype(jnp.int32) - 1
    lo = jnp.minimum(jnp.maximum(amax - (att_range - 1), 0), last)
    hi = jnp.minimum(amax + (att_range - 1), last)
    t = jnp.arange(T, dtype=jnp.int32)[None, :]
    return ((t >= lo[:, None]) & (t <= hi[:, None])).astype(jnp.float32)


def ar_attention_forward(params, input_enc, input_dec, prev_attention, spkr_vec,
                         lengths_enc, speed, *, att_range=10):
    N, T, _ = input_enc.shape
    H = params['enc_w'].shape[1]

    # att_bias_enc (torch caches this across decoder steps via null_bias; recomputing here
    # is identical to the first call after reset_bias).
    x_t = jnp.transpose(input_enc, (0, 2, 1))                                 # (N, E, T)
    bias_enc = enc_bias_call(x_t, params['enc_w'].T, params['enc_b'].reshape(H, 1))

    # per-step vector biases: prenet -> dec projection, spkr projection, speed projection
    dec_spkr = jnp.concatenate([input_dec[:, 0, :], spkr_vec[:, 0, :]], axis=-1)
    if speed is None:
        speed_col = jnp.zeros((N, 1), jnp.float32)       # torch: att_bias_speed = 0
    else:
        speed_col = speed.reshape(N, 1).astype(jnp.float32)
    vec_bias = vec_bias_call(dec_spkr, spkr_vec[:, 0, :], speed_col, params)  # (N, H)

    # Conv1d input taps for prev_attention (single channel, k=31, pad=15)
    prev = prev_attention[:, :, 0]                                            # (N, T)
    prev_pad = jnp.pad(prev, ((0, 0), (15, 15)))
    patches = jnp.stack([prev_pad[:, j:j + T] for j in range(31)], axis=1)    # (N, 31, T)

    # no_grad attention window mask
    mask = window_mask(prev, lengths_enc, att_range, T)[:, None, :]           # (N, 1, T)

    att = attention_call(bias_enc, patches, vec_bias[:, :, None], mask,
                         params['conv_w'], params['att_w'].reshape(1, H),
                         params['att_b'].reshape(1, 1))                       # (N, 1, T)
    return jnp.transpose(att, (0, 2, 1))                                      # (N, T, 1)


# ----------------------------- pure-JAX reference ---------------------------

def ar_attention_reference(params, input_enc, input_dec, prev_attention, spkr_vec,
                           lengths_enc, speed, att_range):
    softsign = lambda x: x / (1.0 + jnp.abs(x))
    N, T, _ = input_enc.shape
    dec_spkr = jnp.concatenate([input_dec[:, 0, :], spkr_vec[:, 0, :]], axis=-1)
    h1 = jax.nn.relu(dec_spkr @ params['pre_w1'] + params['pre_b1'])
    pre = jax.nn.relu(h1 @ params['pre_w2'] + params['pre_b2'])
    bias_enc = softsign(input_enc @ params['enc_w'] + params['enc_b'])
    bias_spkr = softsign(spkr_vec[:, 0, :] @ params['spkr_w'])[:, None, :]
    bias_speed = (speed.reshape(N, 1) @ params['speed_w'])[:, None, :]
    in_dec = (pre @ params['dec_w'])[:, None, :]
    prev = prev_attention[:, :, 0]
    prev_pad = jnp.pad(prev, ((0, 0), (15, 15)))
    taps = jnp.stack([prev_pad[:, j:j + T] for j in range(31)], axis=1)       # (N,31,T)
    in_prev = jnp.einsum('hj,njt->nth', params['conv_w'], taps)
    e = bias_enc + in_dec + bias_spkr + in_prev + bias_speed
    logit = jnp.tanh(e) @ params['att_w'] + params['att_b']                   # (N,T,1)
    mask = window_mask(prev, lengths_enc, att_range, T)[:, :, None]
    att = jnp.exp(logit - jnp.max(logit, axis=1, keepdims=True)) * mask
    return att / jnp.maximum(jnp.sum(jnp.abs(att), axis=1, keepdims=True), 1e-12)


# ----------------------------- params ---------------------------------------

def init_params(rng, enc_hidden, att_hidden, dec_hidden, output_size, spkr_embed_size):
    ks = jax.random.split(rng, 12)

    def nrm(k, shape, scale=0.1):
        return scale * jax.random.normal(k, shape, jnp.float32)

    # Weight layout is (in_dim, out_dim) == transpose of torch nn.Linear.weight.
    return {
        'enc_w': nrm(ks[0], (enc_hidden, att_hidden)),
        'enc_b': nrm(ks[1], (att_hidden,)),
        'spkr_w': nrm(ks[2], (spkr_embed_size, att_hidden)),
        'conv_w': nrm(ks[3], (att_hidden, 31)),            # torch Conv1d weight (H,1,31) squeezed
        'dec_w': nrm(ks[4], (dec_hidden, att_hidden)),
        'speed_w': nrm(ks[5], (1, att_hidden)),
        'att_w': nrm(ks[6], (att_hidden, 1)),
        'att_b': nrm(ks[7], (1,)),
        'pre_w1': nrm(ks[8], (output_size + spkr_embed_size, 2 * dec_hidden)),
        'pre_b1': nrm(ks[9], (2 * dec_hidden,)),
        'pre_w2': nrm(ks[10], (2 * dec_hidden, dec_hidden)),
        'pre_b2': nrm(ks[11], (dec_hidden,)),
    }


# ----------------------------- main ------------------------------------------

if __name__ == "__main__":
    N, T_enc = 2, 8
    enc_hidden, att_hidden, dec_hidden = 32, 32, 32
    output_size, spkr_embed_size = 16, 16
    att_range = 3

    rng = jax.random.PRNGKey(0)
    k_enc, k_dec, k_prev, k_spkr, k_speed, k_par = jax.random.split(rng, 6)

    input_enc = jax.random.normal(k_enc, (N, T_enc, enc_hidden), jnp.float32)
    input_dec = jax.random.normal(k_dec, (N, 1, output_size), jnp.float32)
    spkr_vec = jax.random.normal(k_spkr, (N, 1, spkr_embed_size), jnp.float32)
    speed = 1.0 + 0.1 * jax.random.normal(k_speed, (N,), jnp.float32)
    lengths_enc = jnp.array([8, 6], jnp.int32)

    # previous-step attention: a valid distribution over the valid encoder frames
    valid = jnp.arange(T_enc)[None, :] < lengths_enc[:, None]
    prev_logits = jax.random.normal(k_prev, (N, T_enc), jnp.float32)
    prev_attention = jax.nn.softmax(jnp.where(valid, prev_logits, -1e9), axis=1)[:, :, None]

    params = init_params(k_par, enc_hidden, att_hidden, dec_hidden,
                         output_size, spkr_embed_size)

    fwd = jax.jit(functools.partial(ar_attention_forward, att_range=att_range))
    curr_attention = jax.block_until_ready(
        fwd(params, input_enc, input_dec, prev_attention, spkr_vec, lengths_enc, speed))

    ref = ar_attention_reference(params, input_enc, input_dec, prev_attention,
                                 spkr_vec, lengths_enc, speed, att_range)

    assert curr_attention.shape == (N, T_enc, 1)
    assert bool(jnp.all(jnp.isfinite(curr_attention)))
    assert bool(jnp.allclose(jnp.sum(curr_attention, axis=1), 1.0, atol=1e-3))
    assert bool(jnp.allclose(curr_attention, ref, atol=2e-2)), \
        float(jnp.max(jnp.abs(curr_attention - ref)))
    print("KERNEL_OK")
</pallas_src>

<mosaic_0001>
module attributes {stable_mosaic.version = 11 : i64} {
  func.func @_enc_bias_kernel(%arg0: i32, %arg1: memref<1x32x8xf32, #tpu.memory_space<vmem>>, %arg2: memref<32x32xf32, #tpu.memory_space<vmem>>, %arg3: memref<32x1xf32, #tpu.memory_space<vmem>>, %arg4: memref<1x32x8xf32, #tpu.memory_space<vmem>>) attributes {dimension_semantics = [#tpu.dimension_semantics<parallel>], iteration_bounds = array<i64: 2>, scalar_prefetch = 0 : i64, scratch_operands = 0 : i64, tpu.core_type = #tpu.core_type<tc>, window_params = [{transform_indices = @transform_0, window_bounds = array<i64: 1, 32, 8>}, {pipeline_mode = #tpu.pipeline_mode<synchronous>, transform_indices = @transform_1, window_bounds = array<i64: 32, 32>}, {pipeline_mode = #tpu.pipeline_mode<synchronous>, transform_indices = @transform_2, window_bounds = array<i64: 32, 1>}, {transform_indices = @transform_3, window_bounds = array<i64: 1, 32, 8>}]} {
    %c0 = arith.constant 0 : index
    %c0_0 = arith.constant 0 : index
    %0 = vector.load %arg2[%c0, %c0_0] : memref<32x32xf32, #tpu.memory_space<vmem>>, vector<32x32xf32>
    %1 = arith.truncf %0 : vector<32x32xf32> to vector<32x32xbf16>
    %c0_1 = arith.constant 0 : index
    %c0_2 = arith.constant 0 : index
    %c0_3 = arith.constant 0 : index
    %2 = vector.load %arg1[%c0_1, %c0_2, %c0_3] : memref<1x32x8xf32, #tpu.memory_space<vmem>>, vector<1x32x8xf32>
    %3 = vector.shape_cast %2 : vector<1x32x8xf32> to vector<32x8xf32>
    %4 = arith.truncf %3 : vector<32x8xf32> to vector<32x8xbf16>
    %cst = arith.constant dense<0.000000e+00> : vector<32x8xf32>
    %5 = tpu.matmul %1, %4, %cst {dimension_numbers = #tpu.dot_dimension_numbers<[1], [0], [0], [1], [0, 0, 1, 1], [], []>} : vector<32x32xbf16>, vector<32x8xbf16>, vector<32x8xf32> -> vector<32x8xf32>
    %c0_4 = arith.constant 0 : index
    %c0_5 = arith.constant 0 : index
    %6 = vector.load %arg3[%c0_4, %c0_5] : memref<32x1xf32, #tpu.memory_space<vmem>>, vector<32x1xf32>
    %7 = vector.broadcast %6 : vector<32x1xf32> to vector<32x8xf32>
    %8 = arith.addf %5, %7 : vector<32x8xf32>
    %9 = math.absf %8 : vector<32x8xf32>
    %cst_6 = arith.constant 1.000000e+00 : f32
    %10 = vector.broadcast %cst_6 : f32 to vector<32x8xf32>
    %11 = arith.addf %10, %9 : vector<32x8xf32>
    %12 = arith.divf %8, %11 : vector<32x8xf32>
    %c0_7 = arith.constant 0 : index
    %c0_8 = arith.constant 0 : index
    %c0_9 = arith.constant 0 : index
    %13 = vector.load %arg4[%c0_7, %c0_8, %c0_9] : memref<1x32x8xf32, #tpu.memory_space<vmem>>, vector<1x32x8xf32>
    %14 = vector.shape_cast %13 : vector<1x32x8xf32> to vector<32x8xf32>
    %15 = vector.shape_cast %12 : vector<32x8xf32> to vector<1x32x8xf32>
    tpu.vector_store %arg4[%c0_7, %c0_8, %c0_9], %15 {strides = array<i32>} : memref<1x32x8xf32, #tpu.memory_space<vmem>>, vector<1x32x8xf32>,
    return
  }
  func.func @transform_0(%arg0: i32) -> (i32, i32, i32) {
    %c0_i32 = arith.constant 0 : i32
    %c0_i32_0 = arith.constant 0 : i32
    %c0_i32_1 = arith.constant 0 : i32
    return %arg0, %c0_i32, %c0_i32_0 : i32, i32, i32
  }
  func.func @transform_1(%arg0: i32) -> (i32, i32) {
    %c0_i32 = arith.constant 0 : i32
    %c0_i32_0 = arith.constant 0 : i32
    %c0_i32_1 = arith.constant 0 : i32
    return %c0_i32, %c0_i32_0 : i32, i32
  }
  func.func @transform_2(%arg0: i32) -> (i32, i32) {
    %c0_i32 = arith.constant 0 : i32
    %c0_i32_0 = arith.constant 0 : i32
    %c0_i32_1 = arith.constant 0 : i32
    return %c0_i32, %c0_i32_0 : i32, i32
  }
  func.func @transform_3(%arg0: i32) -> (i32, i32, i32) {
    %c0_i32 = arith.constant 0 : i32
    %c0_i32_0 = arith.constant 0 : i32
    %c0_i32_1 = arith.constant 0 : i32
    return %arg0, %c0_i32, %c0_i32_0 : i32, i32, i32
  }
}

module attributes {stable_mosaic.version = 11 : i64} {
  func.func @_vec_bias_kernel(%arg0: memref<2x32xf32, #tpu.memory_space<vmem>>, %arg1: memref<2x16xf32, #tpu.memory_space<vmem>>, %arg2: memref<2x1xf32, #tpu.memory_space<vmem>>, %arg3: memref<32x64xf32, #tpu.memory_space<vmem>>, %arg4: memref<1x64xf32, #tpu.memory_space<vmem>>, %arg5: memref<64x32xf32, #tpu.memory_space<vmem>>, %arg6: memref<1x32xf32, #tpu.memory_space<vmem>>, %arg7: memref<32x32xf32, #tpu.memory_space<vmem>>, %arg8: memref<16x32xf32, #tpu.memory_space<vmem>>, %arg9: memref<1x32xf32, #tpu.memory_space<vmem>>, %arg10: memref<2x32xf32, #tpu.memory_space<vmem>>) attributes {dimension_semantics = [], scalar_prefetch = 0 : i64, scratch_operands = 0 : i64, tpu.core_type = #tpu.core_type<tc>} {
    %c0 = arith.constant 0 : index
    %c0_0 = arith.constant 0 : index
    %0 = vector.load %arg0[%c0, %c0_0] : memref<2x32xf32, #tpu.memory_space<vmem>>, vector<2x32xf32>
    %c0_1 = arith.constant 0 : index
    %c0_2 = arith.constant 0 : index
    %1 = vector.load %arg3[%c0_1, %c0_2] : memref<32x64xf32, #tpu.memory_space<vmem>>, vector<32x64xf32>
    %cst = arith.constant dense<0.000000e+00> : vector<2x64xf32>
    %2 = tpu.matmul %0, %1, %cst {dimension_numbers = #tpu.dot_dimension_numbers<[1], [0], [0], [1], [0, 0, 1, 1], [], []>} : vector<2x32xf32>, vector<32x64xf32>, vector<2x64xf32> -> vector<2x64xf32>
    %c0_3 = arith.constant 0 : index
    %c0_4 = arith.constant 0 : index
    %3 = vector.load %arg4[%c0_3, %c0_4] : memref<1x64xf32, #tpu.memory_space<vmem>>, vector<1x64xf32>
    %4 = vector.broadcast %3 : vector<1x64xf32> to vector<2x64xf32>
    %5 = arith.addf %2, %4 : vector<2x64xf32>
    %cst_5 = arith.constant 0.000000e+00 : f32
    %6 = vector.broadcast %cst_5 : f32 to vector<2x64xf32>
    %7 = arith.maximumf %5, %6 : vector<2x64xf32>
    %c0_6 = arith.constant 0 : index
    %c0_7 = arith.constant 0 : index
    %8 = vector.load %arg5[%c0_6, %c0_7] : memref<64x32xf32, #tpu.memory_space<vmem>>, vector<64x32xf32>
    %cst_8 = arith.constant dense<0.000000e+00> : vector<2x32xf32>
    %9 = tpu.matmul %7, %8, %cst_8 {dimension_numbers = #tpu.dot_dimension_numbers<[1], [0], [0], [1], [0, 0, 1, 1], [], []>} : vector<2x64xf32>, vector<64x32xf32>, vector<2x32xf32> -> vector<2x32xf32>
    %c0_9 = arith.constant 0 : index
    %c0_10 = arith.constant 0 : index
    %10 = vector.load %arg6[%c0_9, %c0_10] : memref<1x32xf32, #tpu.memory_space<vmem>>, vector<1x32xf32>
    %11 = vector.broadcast %10 : vector<1x32xf32> to vector<2x32xf32>
    %12 = arith.addf %9, %11 : vector<2x32xf32>
    %cst_11 = arith.constant 0.000000e+00 : f32
    %13 = vector.broadcast %cst_11 : f32 to vector<2x32xf32>
    %14 = arith.maximumf %12, %13 : vector<2x32xf32>
    %c0_12 = arith.constant 0 : index
    %c0_13 = arith.constant 0 : index
    %15 = vector.load %arg7[%c0_12, %c0_13] : memref<32x32xf32, #tpu.memory_space<vmem>>, vector<32x32xf32>
    %cst_14 = arith.constant dense<0.000000e+00> : vector<2x32xf32>
    %16 = tpu.matmul %14, %15, %cst_14 {dimension_numbers = #tpu.dot_dimension_numbers<[1], [0], [0], [1], [0, 0, 1, 1], [], []>} : vector<2x32xf32>, vector<32x32xf32>, vector<2x32xf32> -> vector<2x32xf32>
    %c0_15 = arith.constant 0 : index
    %c0_16 = arith.constant 0 : index
    %17 = vector.load %arg1[%c0_15, %c0_16] : memref<2x16xf32, #tpu.memory_space<vmem>>, vector<2x16xf32>
    %c0_17 = arith.constant 0 : index
    %c0_18 = arith.constant 0 : index
    %18 = vector.load %arg8[%c0_17, %c0_18] : memref<16x32xf32, #tpu.memory_space<vmem>>, vector<16x32xf32>
    %cst_19 = arith.constant dense<0.000000e+00> : vector<2x32xf32>
    %19 = tpu.matmul %17, %18, %cst_19 {dimension_numbers = #tpu.dot_dimension_numbers<[1], [0], [0], [1], [0, 0, 1, 1], [], []>} : vector<2x16xf32>, vector<16x32xf32>, vector<2x32xf32> -> vector<2x32xf32>
    %20 = math.absf %19 : vector<2x32xf32>
    %cst_20 = arith.constant 1.000000e+00 : f32
    %21 = vector.broadcast %cst_20 : f32 to vector<2x32xf32>
    %22 = arith.addf %21, %20 : vector<2x32xf32>
    %23 = arith.divf %19, %22 : vector<2x32xf32>
    %c0_21 = arith.constant 0 : index
    %c0_22 = arith.constant 0 : index
    %24 = vector.load %arg2[%c0_21, %c0_22] : memref<2x1xf32, #tpu.memory_space<vmem>>, vector<2x1xf32>
    %c0_23 = arith.constant 0 : index
    %c0_24 = arith.constant 0 : index
    %25 = vector.load %arg9[%c0_23, %c0_24] : memref<1x32xf32, #tpu.memory_space<vmem>>, vector<1x32xf32>
    %26 = vector.broadcast %24 : vector<2x1xf32> to vector<2x32xf32>
    %27 = vector.broadcast %25 : vector<1x32xf32> to vector<2x32xf32>
    %28 = arith.mulf %26, %27 : vector<2x32xf32>
    %29 = arith.addf %16, %23 : vector<2x32xf32>
    %30 = arith.addf %29, %28 : vector<2x32xf32>
    %c0_25 = arith.constant 0 : index
    %c0_26 = arith.constant 0 : index
    %31 = vector.load %arg10[%c0_25, %c0_26] : memref<2x32xf32, #tpu.memory_space<vmem>>, vector<2x32xf32>
    tpu.vector_store %arg10[%c0_25, %c0_26], %30 {strides = array<i32>} : memref<2x32xf32, #tpu.memory_space<vmem>>, vector<2x32xf32>,
    return
  }
}

module attributes {stable_mosaic.version = 11 : i64} {
  func.func @_attention_kernel(%arg0: i32, %arg1: memref<1x32x8xf32, #tpu.memory_space<vmem>>, %arg2: memref<1x31x8xf32, #tpu.memory_space<vmem>>, %arg3: memref<1x32x1xf32, #tpu.memory_space<vmem>>, %arg4: memref<1x1x8xf32, #tpu.memory_space<vmem>>, %arg5: memref<32x31xf32, #tpu.memory_space<vmem>>, %arg6: memref<1x32xf32, #tpu.memory_space<vmem>>, %arg7: memref<1x1xf32, #tpu.memory_space<vmem>>, %arg8: memref<1x1x8xf32, #tpu.memory_space<vmem>>) attributes {dimension_semantics = [#tpu.dimension_semantics<parallel>], iteration_bounds = array<i64: 2>, scalar_prefetch = 0 : i64, scratch_operands = 0 : i64, tpu.core_type = #tpu.core_type<tc>, window_params = [{transform_indices = @transform_0, window_bounds = array<i64: 1, 32, 8>}, {transform_indices = @transform_1, window_bounds = array<i64: 1, 31, 8>}, {transform_indices = @transform_2, window_bounds = array<i64: 1, 32, 1>}, {transform_indices = @transform_3, window_bounds = array<i64: 1, 1, 8>}, {pipeline_mode = #tpu.pipeline_mode<synchronous>, transform_indices = @transform_4, window_bounds = array<i64: 32, 31>}, {pipeline_mode = #tpu.pipeline_mode<synchronous>, transform_indices = @transform_5, window_bounds = array<i64: 1, 32>}, {pipeline_mode = #tpu.pipeline_mode<synchronous>, transform_indices = @transform_6, window_bounds = array<i64: 1, 1>}, {transform_indices = @transform_7, window_bounds = array<i64: 1, 1, 8>}]} {
    %c0 = arith.constant 0 : index
    %c0_0 = arith.constant 0 : index
    %0 = vector.load %arg5[%c0, %c0_0] : memref<32x31xf32, #tpu.memory_space<vmem>>, vector<32x31xf32>
    %1 = arith.truncf %0 : vector<32x31xf32> to vector<32x31xbf16>
    %c0_1 = arith.constant 0 : index
    %c0_2 = arith.constant 0 : index
    %c0_3 = arith.constant 0 : index
    %2 = vector.load %arg2[%c0_1, %c0_2, %c0_3] : memref<1x31x8xf32, #tpu.memory_space<vmem>>, vector<1x31x8xf32>
    %3 = vector.shape_cast %2 : vector<1x31x8xf32> to vector<31x8xf32>
    %4 = arith.truncf %3 : vector<31x8xf32> to vector<31x8xbf16>
    %cst = arith.constant dense<0.000000e+00> : vector<32x8xf32>
    %5 = tpu.matmul %1, %4, %cst {dimension_numbers = #tpu.dot_dimension_numbers<[1], [0], [0], [1], [0, 0, 1, 1], [], []>} : vector<32x31xbf16>, vector<31x8xbf16>, vector<32x8xf32> -> vector<32x8xf32>
    %c0_4 = arith.constant 0 : index
    %c0_5 = arith.constant 0 : index
    %c0_6 = arith.constant 0 : index
    %6 = vector.load %arg1[%c0_4, %c0_5, %c0_6] : memref<1x32x8xf32, #tpu.memory_space<vmem>>, vector<1x32x8xf32>
    %7 = vector.shape_cast %6 : vector<1x32x8xf32> to vector<32x8xf32>
    %8 = arith.addf %7, %5 : vector<32x8xf32>
    %c0_7 = arith.constant 0 : index
    %c0_8 = arith.constant 0 : index
    %c0_9 = arith.constant 0 : index
    %9 = vector.load %arg3[%c0_7, %c0_8, %c0_9] : memref<1x32x1xf32, #tpu.memory_space<vmem>>, vector<1x32x1xf32>
    %10 = vector.shape_cast %9 : vector<1x32x1xf32> to vector<32x1xf32>
    %11 = vector.broadcast %10 : vector<32x1xf32> to vector<32x8xf32>
    %12 = arith.addf %8, %11 : vector<32x8xf32>
    %13 = math.tanh %12 : vector<32x8xf32>
    %c0_10 = arith.constant 0 : index
    %c0_11 = arith.constant 0 : index
    %14 = vector.load %arg6[%c0_10, %c0_11] : memref<1x32xf32, #tpu.memory_space<vmem>>, vector<1x32xf32>
    %cst_12 = arith.constant dense<0.000000e+00> : vector<1x8xf32>
    %15 = tpu.matmul %14, %13, %cst_12 {dimension_numbers = #tpu.dot_dimension_numbers<[1], [0], [0], [1], [0, 0, 1, 1], [], []>} : vector<1x32xf32>, vector<32x8xf32>, vector<1x8xf32> -> vector<1x8xf32>
    %c0_13 = arith.constant 0 : index
    %c0_14 = arith.constant 0 : index
    %16 = vector.load %arg7[%c0_13, %c0_14] : memref<1x1xf32, #tpu.memory_space<vmem>>, vector<1x1xf32>
    %17 = vector.broadcast %16 : vector<1x1xf32> to vector<1x8xf32>
    %18 = arith.addf %15, %17 : vector<1x8xf32>
    %cst_15 = arith.constant dense<0xFF800000> : vector<1xf32>
    %19 = vector.multi_reduction <maximumf>, %18, %cst_15 [1] : vector<1x8xf32> to vector<1xf32>
    %20 = vector.shape_cast %19 : vector<1xf32> to vector<1x1xf32>
    %21 = vector.broadcast %20 : vector<1x1xf32> to vector<1x8xf32>
    %22 = arith.subf %18, %21 : vector<1x8xf32>
    %23 = math.exp %22 : vector<1x8xf32>
    %c0_16 = arith.constant 0 : index
    %c0_17 = arith.constant 0 : index
    %c0_18 = arith.constant 0 : index
    %24 = vector.load %arg4[%c0_16, %c0_17, %c0_18] : memref<1x1x8xf32, #tpu.memory_space<vmem>>, vector<1x1x8xf32>
    %25 = vector.shape_cast %24 : vector<1x1x8xf32> to vector<1x8xf32>
    %26 = arith.mulf %23, %25 : vector<1x8xf32>
    %27 = math.absf %26 : vector<1x8xf32>
    %cst_19 = arith.constant dense<0.000000e+00> : vector<1xf32>
    %28 = vector.multi_reduction <add>, %27, %cst_19 [1] : vector<1x8xf32> to vector<1xf32>
    %29 = vector.shape_cast %28 : vector<1xf32> to vector<1x1xf32>
    %cst_20 = arith.constant 9.99999996E-13 : f32
    %30 = vector.broadcast %cst_20 : f32 to vector<1x1xf32>
    %31 = arith.maximumf %29, %30 : vector<1x1xf32>
    %32 = vector.broadcast %31 : vector<1x1xf32> to vector<1x8xf32>
    %33 = arith.divf %26, %32 : vector<1x8xf32>
    %c0_21 = arith.constant 0 : index
    %c0_22 = arith.constant 0 : index
    %c0_23 = arith.constant 0 : index
    %34 = vector.load %arg8[%c0_21, %c0_22, %c0_23] : memref<1x1x8xf32, #tpu.memory_space<vmem>>, vector<1x1x8xf32>
    %35 = vector.shape_cast %34 : vector<1x1x8xf32> to vector<1x8xf32>
    %36 = vector.shape_cast %33 : vector<1x8xf32> to vector<1x1x8xf32>
    tpu.vector_store %arg8[%c0_21, %c0_22, %c0_23], %36 {strides = array<i32>} : memref<1x1x8xf32, #tpu.memory_space<vmem>>, vector<1x1x8xf32>,
    return
  }
  func.func @transform_0(%arg0: i32) -> (i32, i32, i32) {
    %c0_i32 = arith.constant 0 : i32
    %c0_i32_0 = arith.constant 0 : i32
    %c0_i32_1 = arith.constant 0 : i32
    return %arg0, %c0_i32, %c0_i32_0 : i32, i32, i32
  }
  func.func @transform_1(%arg0: i32) -> (i32, i32, i32) {
    %c0_i32 = arith.constant 0 : i32
    %c0_i32_0 = arith.constant 0 : i32
    %c0_i32_1 = arith.constant 0 : i32
    return %arg0, %c0_i32, %c0_i32_0 : i32, i32, i32
  }
  func.func @transform_2(%arg0: i32) -> (i32, i32, i32) {
    %c0_i32 = arith.constant 0 : i32
    %c0_i32_0 = arith.constant 0 : i32
    %c0_i32_1 = arith.constant 0 : i32
    return %arg0, %c0_i32, %c0_i32_0 : i32, i32, i32
  }
  func.func @transform_3(%arg0: i32) -> (i32, i32, i32) {
    %c0_i32 = arith.constant 0 : i32
    %c0_i32_0 = arith.constant 0 : i32
    %c0_i32_1 = arith.constant 0 : i32
    return %arg0, %c0_i32, %c0_i32_0 : i32, i32, i32
  }
  func.func @transform_4(%arg0: i32) -> (i32, i32) {
    %c0_i32 = arith.constant 0 : i32
    %c0_i32_0 = arith.constant 0 : i32
    %c0_i32_1 = arith.constant 0 : i32
    return %c0_i32, %c0_i32_0 : i32, i32
  }
  func.func @transform_5(%arg0: i32) -> (i32, i32) {
    %c0_i32 = arith.constant 0 : i32
    %c0_i32_0 = arith.constant 0 : i32
    %c0_i32_1 = arith.constant 0 : i32
    return %c0_i32, %c0_i32_0 : i32, i32
  }
  func.func @transform_6(%arg0: i32) -> (i32, i32) {
    %c0_i32 = arith.constant 0 : i32
    %c0_i32_0 = arith.constant 0 : i32
    %c0_i32_1 = arith.constant 0 : i32
    return %c0_i32, %c0_i32_0 : i32, i32
  }
  func.func @transform_7(%arg0: i32) -> (i32, i32, i32) {
    %c0_i32 = arith.constant 0 : i32
    %c0_i32_0 = arith.constant 0 : i32
    %c0_i32_1 = arith.constant 0 : i32
    return %arg0, %c0_i32, %c0_i32_0 : i32, i32, i32
  }
}

</mosaic_0001>

<bundles_post_ra>
// kernel: ar_attention_forward.3
= control target key start
LH: loop header
LB: loop body
LE: loop exit
PB: predicated region body
PF: predicated region fallthrough
CT: control target
= control target key end

     0   :  { %s415_s12 = smov 0   ;;  %s465_s0 = inlined_call_operand.vmem [shape: f32[2,32,8], index: 0, kind: input, shape index: {}]   ;;  %s466_s1 = inlined_call_operand.vmem [shape: f32[32,32], index: 1, kind: input, shape index: {}]   ;;  %s467_s2 = inlined_call_operand.vmem [shape: f32[32,1], index: 2, kind: input, shape index: {}]   ;;  %s468_s3 = inlined_call_operand.vmem [shape: f32[2,32,8], index: 3, kind: output, shape index: {}]  }
   0x1 LB: > { %s340_s13 = sadd.s32 4294967295, %s392_s12   ;;  %p344_p0 = scmp.ge.s32.totalorder %s392_s12, 1  ;;  %s392_s12 = sphi %s415_s12, %s13_s12  }
   0x2   : > { %p137_p1 = scmp.lt.s32.totalorder %s392_s12, 3 }
   0x4   : > { %p138_p2 = pnand %p344_p0, %p137_p1 }
   0x5   : > { %p161_p3 = scmp.lt.s32.totalorder (!%p138_p2), %s340_s13, 1 }
   0x6   : > { %141 = sbr.rel (%p138_p2) target bundleno = 248 (0xf8), region = 32 }
   0xb   : > { %v172_v0 = vld [vmem:[%s466_s1] sm:$0xff]  ;;  %v173_v1 = vld [vmem:[%s466_s1 + $0x8] sm:$0xff]  ;;  %vm208_vm0 = vcmask 261120   ;;  %v394_v3 = vmov 0   ;;  %v186_v4 = vld [vmem:[%s467_s2 + $0x10] sm:$0xff]  ;;  %s470_s13 = smov (!%p161_p3, %s340_s13), 1 }
   0xc   : > { %v176_v2 = vpack.c.bf16 %v173_v1, %v172_v0  ;;  %377 = vset.pattern.permute.xlu1 %v394_v3  ;;  %376 = vset.pattern.permute.xlu0 %v394_v3  ;;  %v184_v5 = vld [vmem:[%s467_s2] sm:$0xff]  ;;  %v187_v6 = vld [vmem:[%s467_s2 + $0x18] sm:$0xff]  ;;  %v185_v7 = vld [vmem:[%s467_s2 + $0x8] sm:$0xff]  ;;  %s353_s26 = sshll.u32 %s470_s13, 5  ;;  %vm280_vm1 = vcmask 64512  }
   0xd   : > { %200 = vperm.xlu1 %377, %v186_v4   ;;  %190 = vperm.xlu0 %376, %v184_v5   ;;  %s165_s29 = scalar_lea.vmem %s465_s0, %s353_s26  ;;  %v174_v14 = vld [vmem:[%s466_s1 + $0x10] sm:$0xff]  ;;  %v175_v15 = vld [vmem:[%s466_s1 + $0x18] sm:$0xff]  ;;  %s170_s9 = scalar_lea.vmem %s468_s3, %s353_s26 }
   0xe   : > { %363 = vmatprep.mubr.msk.bf16.mxu0 %vm208_vm0, %v176_v2  ;;  %v180_v8 = vld [vmem:[%s165_s29 + $0x10] sm:$0xff]  ;;  %v181_v9 = vld [vmem:[%s165_s29 + $0x18] sm:$0xff]  ;;  %v178_v10 = vld [vmem:[%s165_s29] sm:$0xff]  ;;  %v177_v16 = vpack.c.bf16 %v175_v15, %v174_v14 }
   0xf   : > { %v183_v11 = vpack.c.bf16 %v181_v9, %v180_v8  ;;  %v179_v12 = vld [vmem:[%s165_s29 + $0x8] sm:$0xff] }
  0x10   : > { %v182_v13 = vpack.c.bf16 %v179_v12, %v178_v10 }
  0x11   : > { %205 = vperm.xlu1 %377, %v187_v6   ;;  %195 = vperm.xlu0 %376, %v185_v7  }
  0x12   : > { %359 = vmatprep.subr.bf16.mxu0 %v183_v11 }
  0x13   : > { %360 = vmatpush3.bf16.msra.mxu0 %v183_v11 }
  0x14   : > { %361 = vmatprep.subr.bf16.mxu0 %v182_v13 }
  0x17   : > { %362 = vmatpush3.bf16.msra.mxu0 %v182_v13 }
  0x1a   : > { %364 = vmatmul.mubr.msk.bf16.vlgmr.msra.gmra.mxu0 %vm208_vm0, %v177_v16 }
  0x88   : > { %v201_v17 = vpop.permute.xlu1 %200  ;;  %v191_v18 = vpop.permute.xlu0 %190 }
  0x8c   : > { %v206_v24 = vpop.permute.xlu1 %205  ;;  %v196_v29 = vpop.permute.xlu0 %195 }
  0xda   : > { %v365_v19 = vpop.f32.mrf.mxu0 }
  0xdb   : > { %v258_v20 = vadd.f32 %v365_v19, %v201_v17 }
  0xdc   : > { %v249_v21 = vpop.f32.mrf.mxu0 }
  0xdd   : > { %v266_v22 = vand.u32 2147483647, %v258_v20  ;;  %v250_v23 = vadd.f32 %v249_v21, %v191_v18 }
  0xde   : > { %v366_v25 = vpop.f32.mrf.mxu0 }
  0xdf   : > { %v270_v26 = vadd.f32 1.0, %v266_v22  ;;  %v264_v27 = vand.u32 2147483647, %v250_v23  ;;  %v261_v28 = vadd.f32 %v366_v25, %v206_v24 }
  0xe0   : > { %v252_v30 = vpop.f32.mrf.mxu0 }
  0xe1   : > { %378 = vrcp.f32 %v270_v26  ;;  %v268_v31 = vadd.f32 1.0, %v264_v27  ;;  %v267_v32 = vand.u32 2147483647, %v261_v28  ;;  %v253_v33 = vadd.f32 %v252_v30, %v196_v29 }
  0xe3   : > { %380 = vrcp.f32 %v268_v31  ;;  %v271_v34 = vadd.f32 1.0, %v267_v32  ;;  %v265_v35 = vand.u32 2147483647, %v253_v33 }
  0xe5   : > { %382 = vrcp.f32 %v271_v34  ;;  %v269_v36 = vadd.f32 1.0, %v265_v35 }
  0xe7   : > { %384 = vrcp.f32 %v269_v36 }
  0xee   : > { %v379_v37 = vpop.eup %378 }
  0xef   : > { %v277_v38 = vmul.f32 %v379_v37, %v258_v20 }
  0xf0   : > { %v381_v39 = vpop.eup %380 }
  0xf1   : > { %283 = vst.msk [vmem:[%s170_s9 + $0x10] sm:$0xff] %vm280_vm1, %v277_v38  ;;  %v273_v40 = vmul.f32 %v381_v39, %v250_v23 }
  0xf2   : > { %v383_v41 = vpop.eup %382 }
  0xf3   : > { %281 = vst.msk [vmem:[%s170_s9] sm:$0xff] %vm280_vm1, %v273_v40  ;;  %v279_v42 = vmul.f32 %v383_v41, %v261_v28 }
  0xf4   : > { %v385_v43 = vpop.eup %384 }
  0xf5   : > { %284 = vst.msk [vmem:[%s170_s9 + $0x18] sm:$0xff] %vm280_vm1, %v279_v42  ;;  %v275_v44 = vmul.f32 %v385_v43, %v253_v33 }
  0xf7   : > { %282 = vst.msk [vmem:[%s170_s9 + $0x8] sm:$0xff] %vm280_vm1, %v275_v44 }
  0xf8 PF: > { %s13_s12 = sadd.s32 1, %s392_s12  }
  0xf9   : > { %p10_p4 = scmp.ge.s32.totalorder %s13_s12, 4  }
  0xfb   :  { %12 = sbr.rel (!%p10_p4) target bundleno = 1 (0x1), region = 62 }

// kernel: ar_attention_forward.4
= control target key start
LH: loop header
LB: loop body
LE: loop exit
PB: predicated region body
PF: predicated region fallthrough
CT: control target
= control target key end

     0   :  { %v474_v0 = vmov 0.0   ;;  %vm475_vm0 = vmmov 0   ;;  %vm47_vm1 = vcmask 261120   ;;  %vm219_vm2 = vcmask 130048   ;;  %s635_s3 = inlined_call_operand.vmem [shape: f32[32,64], index: 3, kind: input, shape index: {}]   ;;  %s636_s5 = inlined_call_operand.vmem [shape: f32[64,32], index: 5, kind: input, shape index: {}]   ;;  %s637_s0 = inlined_call_operand.vmem [shape: f32[2,32], index: 0, kind: input, shape index: {}]   ;;  %s638_s8 = inlined_call_operand.vmem [shape: f32[16,32], index: 8, kind: input, shape index: {}]   ;;  %s639_s1 = inlined_call_operand.vmem [shape: f32[2,16], index: 1, kind: input, shape index: {}]   ;;  %s640_s7 = inlined_call_operand.vmem [shape: f32[32,32], index: 7, kind: input, shape index: {}]   ;;  %s641_s4 = inlined_call_operand.vmem [shape: f32[1,64], index: 4, kind: input, shape index: {}]   ;;  %s642_s2 = inlined_call_operand.vmem [shape: f32[2,1], index: 2, kind: input, shape index: {}]   ;;  %s643_s6 = inlined_call_operand.vmem [shape: f32[1,32], index: 6, kind: input, shape index: {}]   ;;  %s644_s9 = inlined_call_operand.vmem [shape: f32[1,32], index: 9, kind: input, shape index: {}]   ;;  %s645_s10 = inlined_call_operand.vmem [shape: f32[2,32], index: 10, kind: output, shape index: {}]  }
   0x1   :  { %420 = vmatprep.subr.mxu0 %v474_v0  ;;  %v39_v1 = vld [vmem:[%s635_s3 + $0x18] sm:$0xff]  ;;  %v38_v2 = vld [vmem:[%s635_s3 + $0x10] sm:$0xff]  ;;  %428 = vmatprep.mubr.msk.f32.mxu0 %vm475_vm0, %v474_v0  ;;  %v37_v4 = vld [vmem:[%s635_s3 + $0x8] sm:$0xff]  ;;  %vm137_vm3 = vcmask 523264   ;;  %v476_v27 = vmov 0   ;;  %vm385_vm4 = vcmask 254976  }
   0x2   :  { %421 = vmatpush3.msra.mxu0 %v39_v1  ;;  %431 = vmatprep.subr.mxu1 %v474_v0  ;;  %v129_v3 = vld [vmem:[%s636_s5 + $0x38] sm:$0xff]  ;;  %v128_v5 = vld [vmem:[%s636_s5 + $0x30] sm:$0xff]  ;;  %v127_v6 = vld [vmem:[%s636_s5 + $0x28] sm:$0xff] }
   0x3   :  { %422 = vmatprep.subr.mxu0 %v474_v0  ;;  %432 = vmatpush3.msra.mxu1 %v129_v3  ;;  %v36_v7 = vld [vmem:[%s635_s3] sm:$0xff]  ;;  %v125_v10 = vld [vmem:[%s636_s5 + $0x18] sm:$0xff]  ;;  %v124_v11 = vld [vmem:[%s636_s5 + $0x10] sm:$0xff] }
   0x4   :  { %423 = vmatpush3.msra.mxu0 %v38_v2  ;;  %433 = vmatprep.subr.mxu1 %v474_v0  ;;  %v35_v8 = vld [vmem:[%s637_s0] sm:$0x3]  ;;  %v123_v12 = vld [vmem:[%s636_s5 + $0x8] sm:$0xff]  ;;  %v215_v17 = vld [vmem:[%s640_s7 + $0x18] sm:$0xff] }
   0x5   :  { %424 = vmatprep.subr.mxu0 %v474_v0  ;;  %434 = vmatpush3.msra.mxu1 %v128_v5  ;;  %v126_v9 = vld [vmem:[%s636_s5 + $0x20] sm:$0xff]  ;;  %v218_v14 = vld [vmem:[%s638_s8 + $0x8] sm:$0xff]  ;;  %v214_v23 = vld [vmem:[%s640_s7 + $0x10] sm:$0xff] }
   0x6   :  { %425 = vmatpush3.msra.mxu0 %v37_v4  ;;  %435 = vmatprep.subr.mxu1 %v474_v0  ;;  %v122_v13 = vld [vmem:[%s636_s5] sm:$0xff]  ;;  %v213_v24 = vld [vmem:[%s640_s7 + $0x8] sm:$0xff] }
   0x7   :  { %426 = vmatprep.subr.mxu0 %v474_v0  ;;  %436 = vmatpush3.msra.mxu1 %v127_v6  ;;  %v217_v15 = vld [vmem:[%s638_s8] sm:$0xff] }
   0x8   :  { %427 = vmatpush3.msra.mxu0 %v36_v7  ;;  %437 = vmatprep.subr.mxu1 %v474_v0  ;;  %v216_v16 = vld [vmem:[%s639_s1] sm:$0x3] }
   0x9   :  { %429 = vmatmul.mubr.msk.f32.vlgmr.msra.gmra.mxu0 %vm47_vm1, %v35_v8  ;;  %438 = vmatpush3.msra.mxu1 %v126_v9  ;;  %v391_v18 = vld [vmem:[%s641_s4] ss:$0 sm:$0xff] }
   0xa   :  { %439 = vmatprep.subr.mxu1 %v474_v0  ;;  %447 = vmatprep.mubr.msk.f32.mxu1 %vm475_vm0, %v474_v0  ;;  %v212_v25 = vld [vmem:[%s640_s7] sm:$0xff] }
   0xb   :  { %440 = vmatpush3.msra.mxu1 %v125_v10  ;;  %450 = vmatprep.subr.mxu0 %v474_v0  ;;  %v297_v28 = vld [vmem:[%s642_s2] sm:$0x3] }
   0xc   :  { %441 = vmatprep.subr.mxu1 %v474_v0  ;;  %454 = vmatprep.mubr.msk.f32.mxu0 %vm475_vm0, %v474_v0  ;;  %v393_v30 = vld [vmem:[%s643_s6] ss:$0 sm:$0xff] }
   0xd   :  { %442 = vmatpush3.msra.mxu1 %v124_v11  ;;  %451 = vmatpush3.msra.mxu0 %v218_v14  ;;  %v396_v38 = vld [vmem:[%s644_s9] ss:$0 sm:$0xff] }
   0xe   :  { %443 = vmatprep.subr.mxu1 %v474_v0  ;;  %452 = vmatprep.subr.mxu0 %v474_v0 }
   0xf   :  { %444 = vmatpush3.msra.mxu1 %v123_v12  ;;  %453 = vmatpush3.msra.mxu0 %v217_v15 }
  0x10   :  { %445 = vmatprep.subr.mxu1 %v474_v0  ;;  %455 = vmatmul.mubr.msk.f32.vlgmr.msra.gmra.mxu0 %vm219_vm2, %v216_v16 }
  0x11   :  { %446 = vmatpush3.msra.mxu1 %v122_v13  ;;  %457 = vmatprep.subr.mxu0 %v474_v0 }
  0x12   :  { %458 = vmatpush3.msra.mxu0 %v215_v17  ;;  %465 = vmatprep.mubr.msk.f32.mxu0 %vm475_vm0, %v474_v0 }
  0x13   :  { %459 = vmatprep.subr.mxu0 %v474_v0  ;;  %471 = vset.pattern.permute.xlu0 %v476_v27 }
  0x14   :  { %460 = vmatpush3.msra.mxu0 %v214_v23  ;;  %301 = vperm.xlu0 %471, %v297_v28  }
  0x15   :  { %461 = vmatprep.subr.mxu0 %v474_v0 }
  0x16   :  { %462 = vmatpush3.msra.mxu0 %v213_v24 }
  0x17   :  { %463 = vmatprep.subr.mxu0 %v474_v0 }
  0x18   :  { %464 = vmatpush3.msra.mxu0 %v212_v25 }
  0x8f   :  { %v302_v39 = vpop.permute.xlu0 %301 }
  0x90   :  { %v310_v41 = vmul.f32 %v396_v38, %v302_v39 }
  0xc9   :  { %v117_v19 = vpop.f32.mrf.mxu0 }
  0xca   :  { %v118_v20 = vadd.f32 %v391_v18, %v117_v19 }
  0xcb   :  { %v430_v21 = vpop.f32.mrf.mxu0 }
  0xcc   :  { %v121_v22 = vmax.f32 %v118_v20, 0.0 }
  0xce   :  { %448 = vmatmul.mubr.msk.f32.vlgmr.msra.gmra.mxu1 %vm137_vm3, %v121_v22 }
  0xd0   :  { %v289_v26 = vpop.f32.mrf.mxu0 }
  0xd1   :  { %v293_v35 = vand.u32 2147483647, %v289_v26 }
  0xd2   :  { %v456_v29 = vpop.f32.mrf.mxu0 }
  0xd3   :  { %v294_v36 = vadd.f32 1.0, %v293_v35 }
  0xd5   :  { %472 = vrcp.f32 %v294_v36 }
  0xe2   :  { %v473_v37 = vpop.eup %472 }
  0xe3   :  { %v296_v40 = vmul.f32 %v473_v37, %v289_v26 }
 0x18e   :  { %v207_v31 = vpop.f32.mrf.mxu1 }
 0x18f   :  { %v208_v32 = vadd.f32 %v393_v30, %v207_v31 }
 0x190   :  { %v449_v33 = vpop.f32.mrf.mxu1 }
 0x191   :  { %v211_v34 = vmax.f32 %v208_v32, 0.0 }
 0x193   :  { %466 = vmatmul.mubr.msk.f32.vlgmr.msra.gmra.mxu0 %vm47_vm1, %v211_v34 }
 0x253   :  { %v380_v42 = vpop.f32.mrf.mxu0 }
 0x254   :  { %v381_v43 = vadd.f32 %v380_v42, %v296_v40 }
 0x255   :  { %v467_v44 = vpop.f32.mrf.mxu0 }
 0x256   :  { %v384_v45 = vadd.f32 %v381_v43, %v310_v41 }
 0x258   :  { %386 = vst.msk [vmem:[%s645_s10] sm:$0x3] %vm385_vm4, %v384_v45 }

// kernel: ar_attention_forward.5
= control target key start
LH: loop header
LB: loop body
LE: loop exit
PB: predicated region body
PF: predicated region fallthrough
CT: control target
= control target key end

     0   :  { %s990_s0 = inlined_call_operand.vmem [shape: f32[2,32,8], index: 0, kind: input, shape index: {}]   ;;  %s991_s1 = inlined_call_operand.vmem [shape: f32[2,31,8], index: 1, kind: input, shape index: {}]   ;;  %s992_s2 = inlined_call_operand.vmem [shape: f32[2,32,1], index: 2, kind: input, shape index: {}]   ;;  %s993_s3 = inlined_call_operand.vmem [shape: f32[2,1,8], index: 3, kind: input, shape index: {}]   ;;  %s994_s4 = inlined_call_operand.vmem [shape: f32[32,31], index: 4, kind: input, shape index: {}]   ;;  %s995_s5 = inlined_call_operand.vmem [shape: f32[1,32], index: 5, kind: input, shape index: {}]   ;;  %s996_s6 = inlined_call_operand.<no memory space> [shape: f32[1,1], index: 6, kind: input, shape index: {}]   ;;  %s997_s7 = inlined_call_operand.hbm [shape: f32[2,1,8], index: 7, kind: output, shape index: {}]  }
   0x1   :  { %v12_v0 = vstv %s996_s6 }
   0x2   :  { %13 = vst [vmem:[#allocation2] sm:$0x1] %v12_v0 }
   0x3   :  { %14 = vsyncpa [#allocation4], 0 }
   0x4   :  { %16 = vsyncpa [#allocation4 + $0x1], 0  ;;  %s865_s26 = smov 0   ;;  %s867_s27 = smov 0  }
   0x5   :  { %s869_s28 = smov 0   ;;  %s871_s29 = smov 0  }
   0x6 LB: > { %s886_s6 = sadd.s32 4294967295, %s815_s29   ;;  %s651_s30 = sadd.s32 4294967294, %s815_s29   ;;  %s815_s29 = sphi %s871_s29, %s1003_s29   ;;  %s811_s28 = sphi %s869_s28, %s1002_s28   ;;  %s807_s27 = sphi %s867_s27, %s1001_s27   ;;  %s803_s26 = sphi %s865_s26, %s1000_s26  }
   0x7   : > { %s890_s8 = sadd.s32 1, %s815_s29   ;;  %s196_s9 = sadd.s32 1, %s811_s28 }
   0x8   : > { %s193_s10 = ssub.s32 %s815_s29, %s890_s8  ;;  %p206_p0 = scmp.ne.s32.totalorder %s811_s28, %s807_s27 }
   0x9   : > { %p194_p1 = scmp.eq.s32.totalorder %s193_s10, 0  ;;  %p207_p2 = scmp.eq.s32.totalorder %s886_s6, 1 }
   0xa   : > { %p212_p3 = scmp.ne.s32.totalorder %s807_s27, %s803_s26  ;;  %p213_p4 = scmp.eq.s32.totalorder %s651_s30, 1 }
   0xb   : > { %s901_s11 = scalar_select %p194_p1, %s811_s28, %s196_s9  }
   0xc   : > { %p903_p5 = por %p207_p2, %p206_p0  ;;  %p907_p6 = por %p213_p4, %p212_p3 }
   0xd   : > { %p654_p7 = scmp.ge.s32.totalorder %s815_s29, 1  ;;  %p270_p8 = scmp.lt.s32.totalorder %s815_s29, 3 }
   0xf   : > { %p271_p9 = pnand %p654_p7, %p270_p8 }
  0x10   : > { %p314_p10 = scmp.lt.s32.totalorder (!%p271_p9), %s886_s6, 1  ;;  %s312_s24 = sand.u32 (!%p271_p9), 1, %s807_s27  }
  0x11   : > { %274 = sbr.rel (%p271_p9) target bundleno = 787 (0x313), region = 48  ;;  %s313_s30 = scalar_lea.vmem (!%p271_p9), [#allocation3], %s312_s24 }
  0x12   : > { %s563_s9 = sshll.u32 (!%p271_p9), %s313_s30, 4  ;;  %s551_s15 = scalar_lea.sflag (!%p271_p9), [#allocation4], %s312_s24  ;;  %s564_s9 = int_to_ptr.vmem [resolvable:$true] %s563_s9 }
  0x13   : > { %s755_s16 = scalar_lea.vmem (!%p271_p9), %s564_s9, 16 }
  0x14   : > { %p756_p11 = scmp.ne.s32.totalorder (!%p271_p9), %s564_s9, %s755_s16 }
  0x16   : > { %vm352_vm0 = vcmask 1046528   ;;  %v333_v1 = vld [vmem:[%s994_s4] sm:$0xff]  ;;  %v334_v2 = vld [vmem:[%s994_s4 + $0x8] sm:$0xff]  ;;  %vm345_vm1 = vcmask 252928   ;;  %s921_s18 = scalar_select %p314_p10, %s886_s6, 1  ;;  %v817_v4 = vmov 0   ;;  %v455_v49 = vlaneseq }
  0x17   : > { %v337_v3 = vpack.c.bf16 %v334_v2, %v333_v1  ;;  %741 = vset.pattern.permute.xlu0 %v817_v4  ;;  %742 = vset.pattern.permute.xlu1 %v817_v4  ;;  %vm353_vm2 = vcmask 1047552   ;;  %v818_v5 = vmov 65535   ;;  %v335_v19 = vld [vmem:[%s994_s4 + $0x10] sm:$0xff]  ;;  %v336_v20 = vld [vmem:[%s994_s4 + $0x18] sm:$0xff]  ;;  %v449_v21 = vld [vmem:[#allocation2] sm:$0x1]  ;;  %p757_p12 = pnand %p756_p11, %p903_p5 }
  0x18   : > { %v354_v6 = vsel %vm352_vm0, 4294967295, %v818_v5  ;;  %s925_s19 = sshll.u32 %s921_s18, 5  ;;  %v338_v22 = vpack.c.bf16 %v336_v20, %v335_v19  ;;  %v819_v23 = vmov 0.0   ;;  %vm820_vm3 = vmmov 0   ;;  %v448_v47 = vld [vmem:[%s995_s5] sm:$0x1]  ;;  %s331_s23 = scalar_lea.vmem %s993_s3, %s921_s18 }
  0x19   : > { %683 = vmatprep.mubr.msk.bf16.mxu0 %vm345_vm1, %v337_v3  ;;  %s323_s22 = scalar_lea.vmem %s991_s1, %s925_s19  ;;  %s328_s25 = scalar_lea.vmem %s992_s2, %s925_s19  ;;  %v355_v9 = vsel %vm353_vm2, %v354_v6, 0  ;;  %687 = vmatprep.subr.mxu1 %v819_v23  ;;  %vm459_vm4 = vcmask 261120   ;;  %v456_v50 = vshrl.u32 %v455_v49, 7  ;;  %vm533_vm5 = vcmask 57344   ;;  %v540_v61 = vld [vmem:[%s331_s23] sm:$0x1] }
  0x1a   : > { %v341_v7 = vld [vmem:[%s323_s22 + $0x10] sm:$0xff]  ;;  %v342_v8 = vld [vmem:[%s323_s22 + $0x18] sm:$0x7f]  ;;  %v339_v10 = vld [vmem:[%s323_s22] sm:$0xff]  ;;  %695 = vmatprep.mubr.msk.f32.mxu1 %vm820_vm3, %v819_v23  ;;  %s318_s17 = scalar_lea.vmem %s990_s0, %s925_s19  ;;  %p758_p13 = pneg %p757_p12 }
  0x1b   : > { %v344_v11 = vpack.c.bf16 %v342_v8, %v341_v7  ;;  %v340_v12 = vld [vmem:[%s323_s22 + $0x8] sm:$0xff]  ;;  %v419_v13 = vld [vmem:[%s328_s25 + $0x18] sm:$0xff]  ;;  %v418_v17 = vld [vmem:[%s328_s25 + $0x10] sm:$0xff]  ;;  %v457_v51 = vsub.s32 0, %v456_v50 }
  0x1c   : > { %437 = vperm.xlu0 %741, %v419_v13   ;;  %v417_v14 = vld [vmem:[%s328_s25 + $0x8] sm:$0xff]  ;;  %v343_v16 = vpack.c.bf16 %v340_v12, %v339_v10  ;;  %v416_v18 = vld [vmem:[%s328_s25] sm:$0xff]  ;;  %v410_v26 = vld [vmem:[%s318_s17 + $0x10] sm:$0xff]  ;;  %s664_s25 = sshll.u32 %s886_s6, 4 }
  0x1d   : > { %v357_v15 = vand.u32 %v355_v9, %v344_v11  ;;  %427 = vperm.xlu1 %742, %v417_v14   ;;  %v411_v29 = vld [vmem:[%s318_s17 + $0x18] sm:$0xff]  ;;  %v408_v31 = vld [vmem:[%s318_s17] sm:$0xff]  ;;  %v409_v33 = vld [vmem:[%s318_s17 + $0x8] sm:$0xff]  ;;  %s561_s18 = scalar_lea.hbm %s997_s7, %s664_s25  ;;  %s821_s17 = smov [#allocation3]  }
  0x1e   : > { %s759_s19 = sshll.u32 %s821_s17, 4  ;;  %s760_s19 = int_to_ptr.vmem [resolvable:$false] %s759_s19 }
  0x1f   : > { %679 = vmatprep.subr.bf16.mxu0 %v357_v15  ;;  %s761_s6 = scalar_lea.vmem %s760_s19, 32  ;;  %p762_p0 = scmp.lt.s32.totalorder %s564_s9, %s760_s19 }
  0x20   : > { %680 = vmatpush3.bf16.msra.mxu0 %v357_v15  ;;  %432 = vperm.xlu0 %741, %v418_v17   ;;  %p763_p1 = scmp.lt.s32.totalorder %s761_s6, %s755_s16 }
  0x21   : > { %681 = vmatprep.subr.bf16.mxu0 %v343_v16  ;;  %422 = vperm.xlu1 %742, %v416_v18  }
  0x22   : > { %p764_p2 = por %p763_p1, %p762_p0 }
  0x24   : > { %682 = vmatpush3.bf16.msra.mxu0 %v343_v16  ;;  %452 = vperm.xlu0 %741, %v449_v21   ;;  %p765_p3 = pnand %p764_p2, %p758_p13 }
  0x27   : > { %684 = vmatmul.mubr.msk.bf16.vlgmr.msra.gmra.mxu0 %vm345_vm1, %v338_v22 }
  0x97   : > { %v438_v24 = vpop.permute.xlu0 %437 }
  0x98   : > { %v428_v27 = vpop.permute.xlu1 %427 }
  0x9b   : > { %v433_v35 = vpop.permute.xlu0 %432 }
  0x9c   : > { %v423_v41 = vpop.permute.xlu1 %422 }
  0x9f   : > { %v453_v52 = vpop.permute.xlu0 %452 }
  0xa0   : > { %v458_v53 = vrot.slane %v453_v52, %v457_v51 }
  0xe7   : > { %v685_v25 = vpop.f32.mrf.mxu0 }
  0xe8   : > { %v414_v30 = vadd.f32 %v685_v25, %v410_v26 }
  0xe9   : > { %v393_v28 = vpop.f32.mrf.mxu0 }
  0xea   : > { %v442_v37 = vadd.f32 %v433_v35, %v414_v30  ;;  %v412_v38 = vadd.f32 %v408_v31, %v393_v28 }
  0xeb   : > { %v686_v32 = vpop.f32.mrf.mxu0 }
  0xec   : > { %v415_v34 = vadd.f32 %v686_v32, %v411_v29  ;;  %v440_v43 = vadd.f32 %v423_v41, %v412_v38 }
  0xed   : > { %v396_v36 = vpop.f32.mrf.mxu0 }
  0xee   : > { %v443_v39 = vadd.f32 %v438_v24, %v415_v34  ;;  %v413_v40 = vadd.f32 %v409_v33, %v396_v36 }
  0xf0   : > { %743 = vtanh.f32 %v443_v39  ;;  %v441_v42 = vadd.f32 %v428_v27, %v413_v40 }
  0xf1   : > { %745 = vtanh.f32 %v442_v37 }
  0xf2   : > { %747 = vtanh.f32 %v441_v42 }
  0xf3   : > { %749 = vtanh.f32 %v440_v43 }
  0xfd   : > { %v744_v44 = vpop.eup %743 }
  0xfe   : > { %688 = vmatpush3.msra.mxu1 %v744_v44  ;;  %v746_v45 = vpop.eup %745 }
  0xff   : > { %689 = vmatprep.subr.mxu1 %v819_v23  ;;  %v748_v46 = vpop.eup %747 }
 0x100   : > { %690 = vmatpush3.msra.mxu1 %v746_v45  ;;  %v750_v48 = vpop.eup %749 }
 0x101   : > { %691 = vmatprep.subr.mxu1 %v819_v23 }
 0x102   : > { %692 = vmatpush3.msra.mxu1 %v748_v46 }
 0x103   : > { %693 = vmatprep.subr.mxu1 %v819_v23 }
 0x104   : > { %694 = vmatpush3.msra.mxu1 %v750_v48 }
 0x105   : > { %696 = vmatmul.mubr.msk.f32.vlgmr.msra.gmra.mxu1 %vm459_vm4, %v448_v47 }
 0x1c5   : > { %v529_v54 = vpop.f32.mrf.mxu1 }
 0x1c6   : > { %v530_v55 = vadd.f32 %v529_v54, %v458_v53 }
 0x1c7   : > { %v697_v56 = vpop.f32.mrf.mxu1 }
 0x1c8   : > { %v534_v57 = vsel %vm533_vm5, %v530_v55, -inf }
 0x1c9   : > { %535 = vmax.xlane.f32.xlu1 %v534_v57 }
 0x252   : > { %v536_v58 = vpop.xlane.xlu1 %535 }
 0x253   : > { %v537_v59 = vsub.f32 %v530_v55, %v536_v58 }
 0x255   : > { %v538_v60 = vmul.f32 1.442695, %v537_v59 }
 0x257   : > { %751 = vpow2.f32 %v538_v60 }
 0x264   : > { %v752_v62 = vpop.eup %751 }
 0x265   : > { %v541_v63 = vmul.f32 %v752_v62, %v540_v61 }
 0x267   : > { %v542_v0 = vand.u32 2147483647, %v541_v63 }
 0x269   : > { %v543_v1 = vsel %vm533_vm5, %v542_v0, 0.0 }
 0x26a   : > { %544 = vadd.xlane.f32.xlu0 %v543_v1 }
 0x2f3   : > { %v545_v2 = vpop.xlane.xlu0 %544 }
 0x2f4   : > { %v546_v3 = vmax.f32 %v545_v2, 1e-12 }
 0x2f6   : > { %753 = vrcp.f32 %v546_v3 }
 0x303   : > { %v754_v4 = vpop.eup %753 }
 0x304   : > { %v548_v5 = vmul.f32 %v754_v4, %v541_v63 }
 0x306   : > { %549 = vst.msk [vmem:[%s313_s30] sm:$0x1] %vm533_vm5, %v548_v5 }
 0x307   : > { %768 = shalt.err (!%p765_p3)
}
 0x308   : > { %s769_s20 = scalar_lea.hbm %s561_s18, 16  ;;  %s773_s23 = scalar_lea.hbm %s997_s7, 32 }
 0x309   : > { %p770_p4 = scmp.ne.s32.totalorder %s561_s18, %s769_s20  ;;  %p774_p9 = scmp.lt.s32.totalorder %s561_s18, %s997_s7 }
 0x30a   : > { %p775_p10 = scmp.lt.s32.totalorder %s773_s23, %s769_s20 }
 0x30b   : > { %p771_p7 = pnand %p770_p4, %p903_p5 }
 0x30c   : > { %p776_p11 = por %p775_p10, %p774_p9 }
 0x30d   : > { %p772_p8 = pneg %p771_p7 }
 0x30f   : > { %p777_p12 = pnand %p776_p11, %p772_p8 }
 0x311   : > { %780 = shalt.err (!%p777_p12)
}
 0x312   : > { %698 = dma.vmem_to_hbm [thread:$0]  (%p903_p5), %s564_s9, 16, %s561_s18, %s551_s15  }
 0x313 PF: > { %p704_p13 = scmp.ge.s32.totalorder %s815_s29, 2  ;;  %s575_s30 = sand.u32 1, %s803_s26  }
 0x314   : > { %s576_s10 = scalar_lea.sflag [#allocation4], %s575_s30 }
 0x315   : > { %p701_p0 = pnand %p704_p13, %p907_p6 }
 0x317   : > { %p702_p1 = pneg %p701_p0 }
 0x319   : > { %798 = dma.done.wait (%p702_p1), %s576_s10, 16  }
 0x31a   : > { %800 = vsyncadd (%p702_p1), %s576_s10, 4294967280  ;;  %p19_p2 = scmp.ge.s32.totalorder %s890_s8, 4   ;;  %s1000_s26 = smov %s807_s27 }
 0x31b   : > { %s1001_s27 = smov %s811_s28  ;;  %s1002_s28 = smov %s901_s11 }
 0x31c   : > { %s1003_s29 = smov %s890_s8  ;;  %21 = sbr.rel (!%p19_p2) target bundleno = 6 (0x6), region = 92 }
 0x321   :  { %580 = vsyncpa [#allocation4], 1 }
 0x322   :  { %582 = vsyncpa [#allocation4 + $0x1], 1 }

</bundles_post_ra>
